<compile_context>
chip_gen: v7x
topology: tpu7x:2x2x1
jax: 0.10.0
libtpu: 0.0.40
codegen_flags: <defaults>
</compile_context>

<pallas_src>
import functools

import jax
import jax.numpy as jnp
from jax.experimental import pallas as pl
from jax.experimental.pallas import tpu as pltpu

_LANE = 128          # lane width; feature dims padded to multiples of this
_MIB = 1024 * 1024


def _round_up(n, m):
    return ((n + m - 1) // m) * m


@functools.lru_cache(maxsize=None)
def _physical_vmem_bytes():
    """Per-core VMEM capacity; conservative fallback if the query is unavailable."""
    try:
        return int(pltpu.get_tpu_info().vmem_capacity_bytes)
    except Exception:
        return 64 * _MIB   # assume the tightest budget (v7x per-TensorCore)


def _mlp_kernel(x_ref, w1_ref, w2_ref, w3_ref, o_ref):
    """One batch tile: 3 MXU matmuls + 2 ReLUs. Weights stay VMEM-resident."""
    h = jnp.dot(x_ref[...], w1_ref[...], preferred_element_type=jnp.float32)
    h = jnp.maximum(h, 0.0)
    # Cast activations back to the weight dtype so bf16 weights keep bf16 MXU
    # passes (no-op for f32 weights); accumulation stays f32.
    h = jnp.dot(h.astype(w2_ref.dtype), w2_ref[...], preferred_element_type=jnp.float32)
    h = jnp.maximum(h, 0.0)
    o_ref[...] = jnp.dot(
        h.astype(w3_ref.dtype), w3_ref[...], preferred_element_type=jnp.float32
    ).astype(o_ref.dtype)


def prepare_params(w1, w2, w3, *, lane=_LANE, dtype=jnp.float32):
    """One-time parameter prep (NOT in the per-step hot path).

    PyTorch (out_features, in_features) -> (in, out), zero-padded so every feature
    dim is a multiple of `lane` (lane-dense weights and outputs), optionally cast
    to bf16.  Zero columns are mathematically inert through ReLU and the matmuls.
    """
    input_dim = w1.shape[1]
    width = w1.shape[0]
    num_classes = w3.shape[0]
    width_p = _round_up(width, lane)
    classes_p = _round_up(num_classes, lane)

    def pad_t(w, rows, cols):
        wt = jnp.transpose(w)
        wt = jnp.pad(wt, ((0, rows - wt.shape[0]), (0, cols - wt.shape[1])))
        return wt.astype(dtype)

    w1t = pad_t(w1, input_dim, width_p)   # (input_dim, width_p)
    w2t = pad_t(w2, width_p, width_p)     # (width_p,  width_p)
    w3t = pad_t(w3, width_p, classes_p)   # (width_p,  classes_p)
    return w1t, w2t, w3t


@functools.partial(jax.jit, static_argnames=("num_classes", "block_b"))
def fully_connected_forward(x, w1t, w2t, w3t, *, num_classes, block_b=2048):
    """x: (B, C, H, W) or (B, input_dim). Weights prepared by prepare_params."""
    assert block_b % 8 == 0 and block_b >= 8
    batch = x.shape[0]
    # x.view(B, input_dim); cast to the prepared-weight dtype (bf16 halves the
    # dominant HBM stream; f32 keeps exact parity with the PyTorch module).
    x2d = x.reshape(batch, -1).astype(w1t.dtype)
    input_dim = x2d.shape[1]
    width_p = w1t.shape[1]
    classes_p = w3t.shape[1]
    x_bytes = x2d.dtype.itemsize
    w_bytes = (input_dim * width_p + width_p * width_p + width_p * classes_p) \
        * jnp.dtype(w1t.dtype).itemsize

    # ---- generation-aware cap on the batch tile (fits v7x's 64 MiB VMEM) ------
    budget = min(_physical_vmem_bytes() // 2, 48 * _MIB)
    per_row = 2 * input_dim * x_bytes + 2 * classes_p * 4 + 2 * width_p * 4
    cap_rows = max(256, ((budget - 2 * w_bytes - 4 * _MIB) // per_row) // 8 * 8)
    tile_cap = min(block_b, cap_rows)

    # ---- tile selection: sublane-granular padding only ------------------------
    padded8 = _round_up(batch, 8)
    # >= 4 grid steps for large batches so both v7x TensorCores get multiple
    # tiles and the pipeline has DMA/compute overlap; small batches keep 1 tile.
    min_tiles = max(1, min(4, padded8 // 256))
    n_tiles = max(pl.cdiv(padded8, tile_cap), min_tiles)
    tb = _round_up(pl.cdiv(padded8, n_tiles), 8)
    padded_b = tb * n_tiles
    if padded_b != batch:
        x2d = jnp.pad(x2d, ((0, padded_b - batch), (0, 0)))

    # Explicit scoped-VMEM limit: 2x-buffered x/out tiles + weights + f32 ReLU
    # intermediates, with headroom; v5e's 16 MiB default would cap the tile size.
    vmem_need = (2 * tb * input_dim * x_bytes + 2 * tb * classes_p * 4
                 + 2 * w_bytes + 2 * tb * width_p * 4)
    vmem_limit = int(min(max(vmem_need + 16 * _MIB, 32 * _MIB), 48 * _MIB))

    flops = 2 * padded_b * (input_dim * width_p + width_p * width_p + width_p * classes_p)
    bytes_accessed = padded_b * input_dim * x_bytes + padded_b * classes_p * 4 + w_bytes

    out = pl.pallas_call(
        _mlp_kernel,
        out_shape=jax.ShapeDtypeStruct((padded_b, classes_p), jnp.float32),
        grid=(n_tiles,),
        in_specs=[
            pl.BlockSpec((tb, input_dim), lambda i: (i, 0)),        # batch-tiled x
            pl.BlockSpec((input_dim, width_p), lambda i: (0, 0)),   # resident weights
            pl.BlockSpec((width_p, width_p), lambda i: (0, 0)),
            pl.BlockSpec((width_p, classes_p), lambda i: (0, 0)),
        ],
        out_specs=pl.BlockSpec((tb, classes_p), lambda i: (i, 0)),  # lane-dense store
        compiler_params=pltpu.CompilerParams(
            dimension_semantics=("parallel",),   # shard batch tiles across TCs (v7x)
            vmem_limit_bytes=vmem_limit,
        ),
        cost_estimate=pl.CostEstimate(
            flops=int(flops), transcendentals=0, bytes_accessed=int(bytes_accessed)),
    )(x2d, w1t, w2t, w3t)

    # Strip batch padding and the zero-padded class columns outside the kernel.
    return out[:batch, :num_classes]


def _reference_forward(x, w1, w2, w3):
    """Pure-JAX reference matching the PyTorch module exactly (unpadded weights)."""
    x2d = x.reshape(x.shape[0], -1)
    h = jnp.maximum(x2d @ w1.T, 0.0)
    h = jnp.maximum(h @ w2.T, 0.0)
    return h @ w3.T


if __name__ == "__main__":
    # Module defaults: input_dim=28*28=784, width=50, depth=3, num_classes=10.
    input_dim = 28 * 28
    width = 50
    num_classes = 10

    key = jax.random.PRNGKey(0)
    kx, k1, k2, k3 = jax.random.split(key, 4)

    # Small deterministic input (NCHW image, flattened inside forward).
    batch = 8
    x = jax.random.normal(kx, (batch, 1, 28, 28), dtype=jnp.float32)

    # Deterministic synthetic weights in PyTorch (out_features, in_features) layout.
    w1 = jax.random.normal(k1, (width, input_dim), dtype=jnp.float32) * 0.05
    w2 = jax.random.normal(k2, (width, width), dtype=jnp.float32) * 0.05
    w3 = jax.random.normal(k3, (num_classes, width), dtype=jnp.float32) * 0.05

    # f32 path: exact parity with the PyTorch module.
    params_f32 = jax.block_until_ready(prepare_params(w1, w2, w3, dtype=jnp.float32))
    out = jax.block_until_ready(
        fully_connected_forward(x, *params_f32, num_classes=num_classes))
    ref = _reference_forward(x, w1, w2, w3)
    assert out.shape == (batch, num_classes), out.shape
    assert jnp.allclose(out, ref, atol=1e-3, rtol=1e-3), "mismatch vs reference (f32, batch=8)"

    # Awkward batch: exercises the multi-tile grid and the sublane-only padding path.
    batch2 = 2500
    x2 = jax.random.normal(kx, (batch2, 1, 28, 28), dtype=jnp.float32)
    out2 = jax.block_until_ready(
        fully_connected_forward(x2, *params_f32, num_classes=num_classes))
    ref2 = _reference_forward(x2, w1, w2, w3)
    assert out2.shape == (batch2, num_classes), out2.shape
    assert jnp.allclose(out2, ref2, atol=1e-3, rtol=1e-3), "mismatch vs reference (f32, batch=2500)"

    # bf16 path (perf mode): halves the dominant HBM stream; looser tolerance expected.
    params_bf16 = jax.block_until_ready(prepare_params(w1, w2, w3, dtype=jnp.bfloat16))
    out_bf = jax.block_until_ready(
        fully_connected_forward(x, *params_bf16, num_classes=num_classes))
    assert out_bf.shape == (batch, num_classes), out_bf.shape
    assert jnp.allclose(out_bf, ref, atol=5e-2, rtol=5e-2), "mismatch vs reference (bf16, batch=8)"

    print("KERNEL_OK")
</pallas_src>

<mosaic_0001>
module attributes {stable_mosaic.version = 11 : i64} {
  func.func @_mlp_kernel(%arg0: i32, %arg1: memref<8x784xf32, #tpu.memory_space<vmem>>, %arg2: memref<784x128xf32, #tpu.memory_space<vmem>>, %arg3: memref<128x128xf32, #tpu.memory_space<vmem>>, %arg4: memref<128x128xf32, #tpu.memory_space<vmem>>, %arg5: memref<8x128xf32, #tpu.memory_space<vmem>>) attributes {dimension_semantics = [#tpu.dimension_semantics<parallel>], iteration_bounds = array<i64: 1>, scalar_prefetch = 0 : i64, scratch_operands = 0 : i64, tpu.core_type = #tpu.core_type<tc>, window_params = [{transform_indices = @transform_0, window_bounds = array<i64: 8, 784>}, {pipeline_mode = #tpu.pipeline_mode<synchronous>, transform_indices = @transform_1, window_bounds = array<i64: 784, 128>}, {pipeline_mode = #tpu.pipeline_mode<synchronous>, transform_indices = @transform_2, window_bounds = array<i64: 128, 128>}, {pipeline_mode = #tpu.pipeline_mode<synchronous>, transform_indices = @transform_3, window_bounds = array<i64: 128, 128>}, {transform_indices = @transform_4, window_bounds = array<i64: 8, 128>}]} {
    %c0 = arith.constant 0 : index
    %c0_0 = arith.constant 0 : index
    %0 = vector.load %arg1[%c0, %c0_0] : memref<8x784xf32, #tpu.memory_space<vmem>>, vector<8x784xf32>
    %c0_1 = arith.constant 0 : index
    %c0_2 = arith.constant 0 : index
    %1 = vector.load %arg2[%c0_1, %c0_2] : memref<784x128xf32, #tpu.memory_space<vmem>>, vector<784x128xf32>
    %cst = arith.constant dense<0.000000e+00> : vector<8x128xf32>
    %2 = tpu.matmul %0, %1, %cst {dimension_numbers = #tpu.dot_dimension_numbers<[1], [0], [0], [1], [0, 0, 1, 1], [], []>} : vector<8x784xf32>, vector<784x128xf32>, vector<8x128xf32> -> vector<8x128xf32>
    %cst_3 = arith.constant 0.000000e+00 : f32
    %3 = vector.broadcast %cst_3 : f32 to vector<8x128xf32>
    %4 = arith.maximumf %2, %3 : vector<8x128xf32>
    %c0_4 = arith.constant 0 : index
    %c0_5 = arith.constant 0 : index
    %5 = vector.load %arg3[%c0_4, %c0_5] : memref<128x128xf32, #tpu.memory_space<vmem>>, vector<128x128xf32>
    %cst_6 = arith.constant dense<0.000000e+00> : vector<8x128xf32>
    %6 = tpu.matmul %4, %5, %cst_6 {dimension_numbers = #tpu.dot_dimension_numbers<[1], [0], [0], [1], [0, 0, 1, 1], [], []>} : vector<8x128xf32>, vector<128x128xf32>, vector<8x128xf32> -> vector<8x128xf32>
    %cst_7 = arith.constant 0.000000e+00 : f32
    %7 = vector.broadcast %cst_7 : f32 to vector<8x128xf32>
    %8 = arith.maximumf %6, %7 : vector<8x128xf32>
    %c0_8 = arith.constant 0 : index
    %c0_9 = arith.constant 0 : index
    %9 = vector.load %arg4[%c0_8, %c0_9] : memref<128x128xf32, #tpu.memory_space<vmem>>, vector<128x128xf32>
    %cst_10 = arith.constant dense<0.000000e+00> : vector<8x128xf32>
    %10 = tpu.matmul %8, %9, %cst_10 {dimension_numbers = #tpu.dot_dimension_numbers<[1], [0], [0], [1], [0, 0, 1, 1], [], []>} : vector<8x128xf32>, vector<128x128xf32>, vector<8x128xf32> -> vector<8x128xf32>
    %c0_11 = arith.constant 0 : index
    %c0_12 = arith.constant 0 : index
    %11 = vector.load %arg5[%c0_11, %c0_12] : memref<8x128xf32, #tpu.memory_space<vmem>>, vector<8x128xf32>
    tpu.vector_store %arg5[%c0_11, %c0_12], %10 {strides = array<i32>} : memref<8x128xf32, #tpu.memory_space<vmem>>, vector<8x128xf32>,
    return
  }
  func.func @transform_0(%arg0: i32) -> (i32, i32) {
    %c0_i32 = arith.constant 0 : i32
    %c0_i32_0 = arith.constant 0 : i32
    return %arg0, %c0_i32 : i32, i32
  }
  func.func @transform_1(%arg0: i32) -> (i32, i32) {
    %c0_i32 = arith.constant 0 : i32
    %c0_i32_0 = arith.constant 0 : i32
    %c0_i32_1 = arith.constant 0 : i32
    return %c0_i32, %c0_i32_0 : i32, i32
  }
  func.func @transform_2(%arg0: i32) -> (i32, i32) {
    %c0_i32 = arith.constant 0 : i32
    %c0_i32_0 = arith.constant 0 : i32
    %c0_i32_1 = arith.constant 0 : i32
    return %c0_i32, %c0_i32_0 : i32, i32
  }
  func.func @transform_3(%arg0: i32) -> (i32, i32) {
    %c0_i32 = arith.constant 0 : i32
    %c0_i32_0 = arith.constant 0 : i32
    %c0_i32_1 = arith.constant 0 : i32
    return %c0_i32, %c0_i32_0 : i32, i32
  }
  func.func @transform_4(%arg0: i32) -> (i32, i32) {
    %c0_i32 = arith.constant 0 : i32
    %c0_i32_0 = arith.constant 0 : i32
    return %arg0, %c0_i32 : i32, i32
  }
}

</mosaic_0001>

<bundles_post_ra>
// kernel: fully_connected_forward.1
= control target key start
LH: loop header
LB: loop body
LE: loop exit
PB: predicated region body
PF: predicated region fallthrough
CT: control target
= control target key end

     0   :  { %9 = vsyncpa [#allocation3], 0  ;;  %s1477_s0 = inlined_call_operand.vmem [shape: f32[8,784], index: 0, kind: input, shape index: {}]   ;;  %s1478_s1 = inlined_call_operand.vmem [shape: f32[784,128], index: 1, kind: input, shape index: {}]   ;;  %s1479_s2 = inlined_call_operand.hbm [shape: f32[128,128], index: 2, kind: input, shape index: {}]   ;;  %s1480_s3 = inlined_call_operand.hbm [shape: f32[128,128], index: 3, kind: input, shape index: {}]   ;;  %s1481_s4 = inlined_call_operand.hbm [shape: f32[8,128], index: 4, kind: output, shape index: {}]  }
   0x1   :  { %10 = vsyncpa [#allocation6], 0 }
   0x2   :  { %11 = vsyncpa [#allocation4], 0  ;;  %s1073_s15 = smov [#allocation2]   ;;  %s1001_s19 = scalar_lea.hbm %s1479_s2, 2048 }
   0x3   :  { %s21_s16 = sshll.u32 %s1073_s15, 4  ;;  %p1002_p0 = scmp.ne.s32.totalorder %s1479_s2, %s1001_s19  ;;  %s22_s16 = int_to_ptr.vmem [resolvable:$true] %s21_s16 }
   0x4   :  { %p1005_p1 = scmp.lt.u32.totalorder %s1001_s19, %s1479_s2 }
   0x6   :  { %p1007_p2 = pnand %p1005_p1, %p1002_p0 }
   0x8   :  { %1010 = shalt.err (!%p1007_p2)
}
   0x9   :  { %s1011_s24 = scalar_lea.vmem %s22_s16, 2048  ;;  %p1016_p4 = scmp.lt.s32.totalorder %s22_s16, %s22_s16 }
   0xa   :  { %p1012_p3 = scmp.ne.s32.totalorder %s22_s16, %s1011_s24  ;;  %p1017_p5 = scmp.lt.s32.totalorder %s1011_s24, %s1011_s24 }
   0xc   :  { %p1018_p6 = por %p1017_p5, %p1016_p4 }
   0xe   :  { %p1019_p7 = pnand %p1018_p6, %p1012_p3 }
  0x10   :  { %1022 = shalt.err (!%p1019_p7)
}
  0x11   :  { %s1074_s25 = smov 128   ;;  %s1075_s26 = smov 8  }
  0x12   :  { %27 = dma.hbm_to_vmem [thread:$0]  %s1479_s2, 2048, %s22_s16, [#allocation3], %s1074_s25, %s1074_s25, %s1075_s26  }
  0x13   :  { %s1076_s29 = smov [#allocation5]   ;;  %s1023_s7 = scalar_lea.hbm %s1480_s3, 2048 }
  0x14   :  { %s33_s30 = sshll.u32 %s1076_s29, 4  ;;  %p1024_p8 = scmp.ne.s32.totalorder %s1480_s3, %s1023_s7  ;;  %s34_s30 = int_to_ptr.vmem [resolvable:$true] %s33_s30 }
  0x15   :  { %p1027_p9 = scmp.lt.u32.totalorder %s1023_s7, %s1480_s3 }
  0x17   :  { %p1029_p10 = pnand %p1027_p9, %p1024_p8 }
  0x19   :  { %1032 = shalt.err (!%p1029_p10)
}
  0x1a   :  { %s1033_s12 = scalar_lea.vmem %s34_s30, 2048  ;;  %p1038_p12 = scmp.lt.s32.totalorder %s34_s30, %s34_s30 }
  0x1b   :  { %p1034_p11 = scmp.ne.s32.totalorder %s34_s30, %s1033_s12  ;;  %p1039_p13 = scmp.lt.s32.totalorder %s1033_s12, %s1033_s12 }
  0x1d   :  { %p1040_p0 = por %p1039_p13, %p1038_p12 }
  0x1f   :  { %p1041_p1 = pnand %p1040_p0, %p1034_p11 }
  0x21   :  { %1044 = shalt.err (!%p1041_p1)
}
  0x22   :  { %39 = dma.hbm_to_vmem [thread:$0]  %s1480_s3, 2048, %s34_s30, [#allocation6], %s1074_s25, %s1074_s25, %s1075_s26  }
  0x23   :  { %1067 = dma.done.wait [#allocation3], 2048  }
  0x24   :  { %1068 = vsyncadd [#allocation3], 4294965248 }
  0x25   :  { %1069 = dma.done.wait [#allocation6], 2048  }
  0x26   :  { %1070 = vsyncadd [#allocation6], 4294965248  ;;  %v69_v0 = vld [vmem:[%s1478_s1 + $0x80] sm:$0xff]  ;;  %v70_v1 = vld [vmem:[%s1478_s1 + $0x88] sm:$0xff]  ;;  %vm1078_vm0 = vmmov 0   ;;  %vm151_vm1 = vcmask 130048  }
  0x27   :  { %v101_v2 = vld [vmem:[%s1478_s1 + $0x180] sm:$0xff]  ;;  %v846_v3 = vpack.c.bf16 %v70_v1, %v69_v0  ;;  %v102_v4 = vld [vmem:[%s1478_s1 + $0x188] sm:$0xff]  ;;  %v71_v11 = vld [vmem:[%s1478_s1 + $0x90] sm:$0xff] }
  0x28   :  { %v53_v5 = vld [vmem:[%s1478_s1] sm:$0xff]  ;;  %v54_v6 = vld [vmem:[%s1478_s1 + $0x8] sm:$0xff]  ;;  %v878_v7 = vpack.c.bf16 %v102_v4, %v101_v2  ;;  %v72_v13 = vld [vmem:[%s1478_s1 + $0x98] sm:$0xff] }
  0x29   :  { %v848_v8 = vpack.c.bf16 %v54_v6, %v53_v5  ;;  %v85_v9 = vld [vmem:[%s1478_s1 + $0x100] sm:$0xff]  ;;  %v86_v10 = vld [vmem:[%s1478_s1 + $0x108] sm:$0xff]  ;;  %847 = vmatprep.subr.bf16.mxu0 %v846_v3  ;;  %v103_v14 = vld [vmem:[%s1478_s1 + $0x190] sm:$0xff]  ;;  %v850_v16 = vpack.c.bf16 %v72_v13, %v71_v11 }
  0x2a   :  { %v880_v12 = vpack.c.bf16 %v86_v10, %v85_v9  ;;  %v104_v15 = vld [vmem:[%s1478_s1 + $0x198] sm:$0xff]  ;;  %879 = vmatprep.subr.bf16.mxu1 %v878_v7  ;;  %v55_v18 = vld [vmem:[%s1478_s1 + $0x10] sm:$0xff]  ;;  %v73_v23 = vld [vmem:[%s1478_s1 + $0xa0] sm:$0xff] }
  0x2b   :  { %849 = vmatpush3.bf16.msra.mxu0 %v848_v8  ;;  %v882_v17 = vpack.c.bf16 %v104_v15, %v103_v14  ;;  %v56_v19 = vld [vmem:[%s1478_s1 + $0x18] sm:$0xff]  ;;  %v87_v20 = vld [vmem:[%s1478_s1 + $0x110] sm:$0xff]  ;;  %v74_v24 = vld [vmem:[%s1478_s1 + $0xa8] sm:$0xff] }
  0x2c   :  { %881 = vmatpush3.bf16.msra.mxu1 %v880_v12  ;;  %v852_v21 = vpack.c.bf16 %v56_v19, %v55_v18  ;;  %v88_v22 = vld [vmem:[%s1478_s1 + $0x118] sm:$0xff]  ;;  %851 = vmatprep.subr.bf16.mxu0 %v850_v16  ;;  %v854_v26 = vpack.c.bf16 %v74_v24, %v73_v23  ;;  %v105_v27 = vld [vmem:[%s1478_s1 + $0x1a0] sm:$0xff]  ;;  %v106_v28 = vld [vmem:[%s1478_s1 + $0x1a8] sm:$0xff] }
  0x2d   :  { %883 = vmatprep.subr.bf16.mxu1 %v882_v17  ;;  %v884_v25 = vpack.c.bf16 %v88_v22, %v87_v20  ;;  %v57_v29 = vld [vmem:[%s1478_s1 + $0x20] sm:$0xff]  ;;  %v886_v30 = vpack.c.bf16 %v106_v28, %v105_v27  ;;  %v58_v31 = vld [vmem:[%s1478_s1 + $0x28] sm:$0xff]  ;;  %v75_v35 = vld [vmem:[%s1478_s1 + $0xb0] sm:$0xff] }
  0x2e   :  { %v89_v32 = vld [vmem:[%s1478_s1 + $0x120] sm:$0xff]  ;;  %v90_v33 = vld [vmem:[%s1478_s1 + $0x128] sm:$0xff]  ;;  %v856_v34 = vpack.c.bf16 %v58_v31, %v57_v29  ;;  %v76_v36 = vld [vmem:[%s1478_s1 + $0xb8] sm:$0xff] }
  0x2f   :  { %853 = vmatpush3.bf16.msra.mxu0 %v852_v21  ;;  %v107_v37 = vld [vmem:[%s1478_s1 + $0x1b0] sm:$0xff]  ;;  %v888_v38 = vpack.c.bf16 %v90_v33, %v89_v32  ;;  %v858_v39 = vpack.c.bf16 %v76_v36, %v75_v35  ;;  %v108_v40 = vld [vmem:[%s1478_s1 + $0x1b8] sm:$0xff]  ;;  %v77_v46 = vld [vmem:[%s1478_s1 + $0xc0] sm:$0xff] }
  0x30   :  { %885 = vmatpush3.bf16.msra.mxu1 %v884_v25  ;;  %855 = vmatprep.subr.bf16.mxu0 %v854_v26  ;;  %v59_v41 = vld [vmem:[%s1478_s1 + $0x30] sm:$0xff]  ;;  %v60_v42 = vld [vmem:[%s1478_s1 + $0x38] sm:$0xff]  ;;  %v890_v43 = vpack.c.bf16 %v108_v40, %v107_v37  ;;  %v78_v47 = vld [vmem:[%s1478_s1 + $0xc8] sm:$0xff] }
  0x31   :  { %887 = vmatprep.subr.bf16.mxu1 %v886_v30  ;;  %v91_v44 = vld [vmem:[%s1478_s1 + $0x130] sm:$0xff]  ;;  %v92_v45 = vld [vmem:[%s1478_s1 + $0x138] sm:$0xff]  ;;  %v109_v48 = vld [vmem:[%s1478_s1 + $0x1c0] sm:$0xff]  ;;  %v860_v50 = vpack.c.bf16 %v60_v42, %v59_v41  ;;  %v862_v52 = vpack.c.bf16 %v78_v47, %v77_v46 }
  0x32   :  { %v110_v49 = vld [vmem:[%s1478_s1 + $0x1c8] sm:$0xff]  ;;  %v892_v51 = vpack.c.bf16 %v92_v45, %v91_v44  ;;  %v61_v53 = vld [vmem:[%s1478_s1 + $0x40] sm:$0xff]  ;;  %v79_v58 = vld [vmem:[%s1478_s1 + $0xd0] sm:$0xff] }
  0x33   :  { %857 = vmatpush3.bf16.msra.mxu0 %v856_v34  ;;  %v62_v54 = vld [vmem:[%s1478_s1 + $0x48] sm:$0xff]  ;;  %v93_v55 = vld [vmem:[%s1478_s1 + $0x140] sm:$0xff]  ;;  %v894_v56 = vpack.c.bf16 %v110_v49, %v109_v48  ;;  %v80_v59 = vld [vmem:[%s1478_s1 + $0xd8] sm:$0xff] }
  0x34   :  { %889 = vmatpush3.bf16.msra.mxu1 %v888_v38  ;;  %859 = vmatprep.subr.bf16.mxu0 %v858_v39  ;;  %v94_v57 = vld [vmem:[%s1478_s1 + $0x148] sm:$0xff]  ;;  %v111_v60 = vld [vmem:[%s1478_s1 + $0x1d0] sm:$0xff]  ;;  %v112_v61 = vld [vmem:[%s1478_s1 + $0x1d8] sm:$0xff]  ;;  %v864_v62 = vpack.c.bf16 %v62_v54, %v61_v53  ;;  %v866_v0 = vpack.c.bf16 %v80_v59, %v79_v58 }
  0x35   :  { %891 = vmatprep.subr.bf16.mxu1 %v890_v43  ;;  %v896_v63 = vpack.c.bf16 %v94_v57, %v93_v55  ;;  %v63_v1 = vld [vmem:[%s1478_s1 + $0x50] sm:$0xff]  ;;  %v64_v2 = vld [vmem:[%s1478_s1 + $0x58] sm:$0xff]  ;;  %v898_v4 = vpack.c.bf16 %v112_v61, %v111_v60  ;;  %v81_v6 = vld [vmem:[%s1478_s1 + $0xe0] sm:$0xff]  ;;  %v1079_v60 = vmov 0.0  }
  0x36   :  { %v95_v3 = vld [vmem:[%s1478_s1 + $0x150] sm:$0xff]  ;;  %v96_v5 = vld [vmem:[%s1478_s1 + $0x158] sm:$0xff]  ;;  %v82_v7 = vld [vmem:[%s1478_s1 + $0xe8] sm:$0xff]  ;;  %v868_v10 = vpack.c.bf16 %v64_v2, %v63_v1 }
  0x37   :  { %861 = vmatpush3.bf16.msra.mxu0 %v860_v50  ;;  %v113_v8 = vld [vmem:[%s1478_s1 + $0x1e0] sm:$0xff]  ;;  %v114_v9 = vld [vmem:[%s1478_s1 + $0x1e8] sm:$0xff]  ;;  %v900_v13 = vpack.c.bf16 %v96_v5, %v95_v3  ;;  %v870_v14 = vpack.c.bf16 %v82_v7, %v81_v6  ;;  %v49_v17 = vld [vmem:[%s1477_s0 + $0x18] sm:$0xff]  ;;  %v1077_v50 = vmov 0.0|0.0  }
  0x38   :  { %893 = vmatpush3.bf16.msra.mxu1 %v892_v51  ;;  %863 = vmatprep.subr.bf16.mxu0 %v862_v52  ;;  %v65_v11 = vld [vmem:[%s1478_s1 + $0x60] sm:$0xff]  ;;  %v66_v12 = vld [vmem:[%s1478_s1 + $0x68] sm:$0xff]  ;;  %v902_v18 = vpack.c.bf16 %v114_v9, %v113_v8  ;;  %v83_v20 = vld [vmem:[%s1478_s1 + $0xf0] sm:$0xff] }
  0x39   :  { %895 = vmatprep.subr.bf16.mxu1 %v894_v56  ;;  %v97_v15 = vld [vmem:[%s1478_s1 + $0x160] sm:$0xff]  ;;  %v47_v16 = vld [vmem:[%s1477_s0 + $0x8] sm:$0xff]  ;;  %v84_v21 = vld [vmem:[%s1478_s1 + $0xf8] sm:$0xff]  ;;  %289 = vmatprep.mubr.f32.mxu1 %v49_v17  ;;  %v872_v24 = vpack.c.bf16 %v66_v12, %v65_v11 }
  0x3a   :  { %v98_v19 = vld [vmem:[%s1478_s1 + $0x168] sm:$0xff]  ;;  %219 = vmatprep.mubr.f32.mxu0 %v47_v16  ;;  %v115_v22 = vld [vmem:[%s1478_s1 + $0x1f0] sm:$0xff]  ;;  %v116_v23 = vld [vmem:[%s1478_s1 + $0x1f8] sm:$0xff]  ;;  %v874_v26 = vpack.c.bf16 %v84_v21, %v83_v20 }
  0x3b   :  { %865 = vmatpush3.bf16.msra.mxu0 %v864_v62  ;;  %v904_v25 = vpack.c.bf16 %v98_v19, %v97_v15  ;;  %v67_v27 = vld [vmem:[%s1478_s1 + $0x70] sm:$0xff]  ;;  %v68_v28 = vld [vmem:[%s1478_s1 + $0x78] sm:$0xff]  ;;  %v906_v30 = vpack.c.bf16 %v116_v23, %v115_v22  ;;  %v133_v32 = vld [vmem:[%s1478_s1 + $0x280] sm:$0xff] }
  0x3c   :  { %897 = vmatpush3.bf16.msra.mxu1 %v896_v63  ;;  %867 = vmatprep.subr.bf16.mxu0 %v866_v0  ;;  %v99_v29 = vld [vmem:[%s1478_s1 + $0x170] sm:$0xff]  ;;  %v100_v31 = vld [vmem:[%s1478_s1 + $0x178] sm:$0xff]  ;;  %v134_v33 = vld [vmem:[%s1478_s1 + $0x288] sm:$0xff]  ;;  %v876_v34 = vpack.c.bf16 %v68_v28, %v67_v27 }
  0x3d   :  { %899 = vmatprep.subr.bf16.mxu1 %v898_v4  ;;  %v908_v35 = vpack.c.bf16 %v100_v31, %v99_v29  ;;  %v910_v36 = vpack.c.bf16 %v134_v33, %v133_v32  ;;  %v117_v37 = vld [vmem:[%s1478_s1 + $0x200] sm:$0xff]  ;;  %v118_v38 = vld [vmem:[%s1478_s1 + $0x208] sm:$0xff]  ;;  %v135_v39 = vld [vmem:[%s1478_s1 + $0x290] sm:$0xff] }
  0x3e   :  { %v136_v40 = vld [vmem:[%s1478_s1 + $0x298] sm:$0xff]  ;;  %v46_v41 = vld [vmem:[%s1477_s0] sm:$0xff]  ;;  %v48_v42 = vld [vmem:[%s1477_s0 + $0x10] sm:$0xff]  ;;  %v912_v43 = vpack.c.bf16 %v118_v38, %v117_v37 }
  0x3f   :  { %869 = vmatpush3.bf16.msra.mxu0 %v868_v10  ;;  %v119_v44 = vld [vmem:[%s1478_s1 + $0x210] sm:$0xff]  ;;  %v914_v45 = vpack.c.bf16 %v136_v40, %v135_v39  ;;  %v120_v46 = vld [vmem:[%s1478_s1 + $0x218] sm:$0xff]  ;;  %v137_v47 = vld [vmem:[%s1478_s1 + $0x2a0] sm:$0xff] }
  0x40   :  { %901 = vmatpush3.bf16.msra.mxu1 %v900_v13  ;;  %871 = vmatprep.subr.bf16.mxu0 %v870_v14  ;;  %v138_v48 = vld [vmem:[%s1478_s1 + $0x2a8] sm:$0xff]  ;;  %v149_v51 = vld [vmem:[%s1478_s1 + $0x300] sm:$0xff]  ;;  %v916_v54 = vpack.c.bf16 %v120_v46, %v119_v44  ;;  %v139_v58 = vld [vmem:[%s1478_s1 + $0x2b0] sm:$0xff] }
  0x41   :  { %903 = vmatprep.subr.bf16.mxu1 %v902_v18  ;;  %v51_v49 = vld [vmem:[%s1477_s0 + $0x28] sm:$0xff]  ;;  %v918_v55 = vpack.c.bf16 %v138_v48, %v137_v47  ;;  %v121_v56 = vld [vmem:[%s1478_s1 + $0x220] sm:$0xff]  ;;  %v140_v59 = vld [vmem:[%s1478_s1 + $0x2b8] sm:$0xff] }
  0x42   :  { %v150_v52 = vld [vmem:[%s1478_s1 + $0x308] sm:$0xff]  ;;  %v52_v61 = vld [vmem:[%s1477_s0 + $0x30] sm:$0xff]  ;;  %v922_v63 = vpack.c.bf16 %v140_v59, %v139_v58  ;;  %v124_v1 = vld [vmem:[%s1478_s1 + $0x238] sm:$0xff] }
  0x43   :  { %873 = vmatpush3.bf16.msra.mxu0 %v872_v24  ;;  %v943_v53 = vpack.c.bf16 %v150_v52, %v149_v51  ;;  %v122_v57 = vld [vmem:[%s1478_s1 + $0x228] sm:$0xff]  ;;  %v123_v0 = vld [vmem:[%s1478_s1 + $0x230] sm:$0xff]  ;;  %v141_v2 = vld [vmem:[%s1478_s1 + $0x2c0] sm:$0xff] }
  0x44   :  { %905 = vmatpush3.bf16.msra.mxu1 %v904_v25  ;;  %875 = vmatprep.subr.bf16.mxu0 %v874_v26  ;;  %v920_v62 = vpack.c.bf16 %v122_v57, %v121_v56  ;;  %v142_v3 = vld [vmem:[%s1478_s1 + $0x2c8] sm:$0xff]  ;;  %v924_v4 = vpack.c.bf16 %v124_v1, %v123_v0  ;;  %v125_v6 = vld [vmem:[%s1478_s1 + $0x240] sm:$0xff]  ;;  %v143_v8 = vld [vmem:[%s1478_s1 + $0x2d0] sm:$0xff] }
  0x45   :  { %907 = vmatprep.subr.bf16.mxu1 %v906_v30  ;;  %v926_v5 = vpack.c.bf16 %v142_v3, %v141_v2  ;;  %v126_v7 = vld [vmem:[%s1478_s1 + $0x248] sm:$0xff]  ;;  %v144_v9 = vld [vmem:[%s1478_s1 + $0x2d8] sm:$0xff]  ;;  %v127_v12 = vld [vmem:[%s1478_s1 + $0x250] sm:$0xff] }
  0x46   :  { %v928_v10 = vpack.c.bf16 %v126_v7, %v125_v6  ;;  %v930_v11 = vpack.c.bf16 %v144_v9, %v143_v8  ;;  %v128_v13 = vld [vmem:[%s1478_s1 + $0x258] sm:$0xff]  ;;  %v145_v14 = vld [vmem:[%s1478_s1 + $0x2e0] sm:$0xff]  ;;  %v146_v15 = vld [vmem:[%s1478_s1 + $0x2e8] sm:$0xff] }
  0x47   :  { %877 = vmatpush3.bf16.msra.mxu0 %v876_v34  ;;  %v932_v16 = vpack.c.bf16 %v128_v13, %v127_v12  ;;  %v934_v17 = vpack.c.bf16 %v146_v15, %v145_v14  ;;  %v129_v18 = vld [vmem:[%s1478_s1 + $0x260] sm:$0xff]  ;;  %v130_v19 = vld [vmem:[%s1478_s1 + $0x268] sm:$0xff]  ;;  %v147_v20 = vld [vmem:[%s1478_s1 + $0x2f0] sm:$0xff] }
  0x48   :  { %909 = vmatpush3.bf16.msra.mxu1 %v908_v35  ;;  %911 = vmatprep.subr.bf16.mxu0 %v910_v36  ;;  %v148_v21 = vld [vmem:[%s1478_s1 + $0x2f8] sm:$0xff]  ;;  %v936_v22 = vpack.c.bf16 %v130_v19, %v129_v18  ;;  %v131_v24 = vld [vmem:[%s1478_s1 + $0x270] sm:$0xff]  ;;  %v50_v27 = vld [vmem:[%s1477_s0 + $0x20] sm:$0xff]  ;;  %s1080_s0 = smov [#allocation7]  }
  0x49   :  { %942 = vmatprep.subr.bf16.mxu1 %v1077_v50  ;;  %v938_v23 = vpack.c.bf16 %v148_v21, %v147_v20  ;;  %v132_v25 = vld [vmem:[%s1478_s1 + $0x278] sm:$0xff]  ;;  %v436_v28 = vld [vmem:[#allocation2] sm:$0xff]  ;;  %v438_v30 = vld [vmem:[#allocation2 + $0x10] sm:$0xff]  ;;  %s616_s1 = sshll.u32 %s1080_s0, 4  ;;  %s617_s1 = int_to_ptr.vmem [resolvable:$true] %s616_s1 }
  0x4a   :  { %220 = vmatmul.mubr.f32.vlgmr.msra.gmra.mrb[0].mxu0 %v46_v41  ;;  %v940_v26 = vpack.c.bf16 %v132_v25, %v131_v24  ;;  %v437_v29 = vld [vmem:[#allocation2 + $0x8] sm:$0xff]  ;;  %v439_v32 = vld [vmem:[#allocation2 + $0x18] sm:$0xff]  ;;  %v440_v34 = vld [vmem:[#allocation2 + $0x20] sm:$0xff]  ;;  %s1045_s27 = scalar_lea.vmem %s617_s1, 128  ;;  %p1050_p3 = scmp.lt.s32.totalorder %s617_s1, %s617_s1 }
  0x4b   :  { %290 = vmatmul.mubr.f32.vlgmr.msra.gmra.mrb[0].mxu1 %v48_v42  ;;  %913 = vmatpush3.bf16.msra.mxu0 %v912_v43  ;;  %v946_v31 = vpack.c.bf16 %v437_v29, %v436_v28  ;;  %v949_v33 = vpack.c.bf16 %v439_v32, %v438_v30  ;;  %v441_v35 = vld [vmem:[#allocation2 + $0x28] sm:$0xff]  ;;  %v442_v37 = vld [vmem:[#allocation2 + $0x30] sm:$0xff]  ;;  %v443_v38 = vld [vmem:[#allocation2 + $0x38] sm:$0xff]  ;;  %p1046_p2 = scmp.ne.s32.totalorder %s617_s1, %s1045_s27  ;;  %p1051_p4 = scmp.lt.s32.totalorder %s1045_s27, %s1045_s27 }
  0x4c   :  { %915 = vmatprep.subr.bf16.mxu0 %v914_v45  ;;  %359 = vmatprep.mubr.f32.mxu0 %v51_v49  ;;  %v952_v36 = vpack.c.bf16 %v441_v35, %v440_v34  ;;  %v955_v39 = vpack.c.bf16 %v443_v38, %v442_v37  ;;  %v444_v40 = vld [vmem:[#allocation2 + $0x40] sm:$0xff]  ;;  %v445_v41 = vld [vmem:[#allocation2 + $0x48] sm:$0xff]  ;;  %v446_v43 = vld [vmem:[#allocation2 + $0x50] sm:$0xff] }
  0x4d   :  { %944 = vmatpush3.bf16.msra.mxu1 %v943_v53  ;;  %773 = vmatprep.mubr.msk.f32.mxu1 %vm1078_vm0, %v1079_v60  ;;  %v958_v42 = vpack.c.bf16 %v445_v41, %v444_v40  ;;  %v447_v44 = vld [vmem:[#allocation2 + $0x58] sm:$0xff]  ;;  %v448_v46 = vld [vmem:[#allocation2 + $0x60] sm:$0xff]  ;;  %v449_v47 = vld [vmem:[#allocation2 + $0x68] sm:$0xff]  ;;  %p1052_p5 = por %p1051_p4, %p1050_p3 }
  0x4e   :  { %945 = vmatprep.subr.bf16.mxu1 %v1077_v50  ;;  %v961_v45 = vpack.c.bf16 %v447_v44, %v446_v43  ;;  %v964_v48 = vpack.c.bf16 %v449_v47, %v448_v46  ;;  %v450_v49 = vld [vmem:[#allocation2 + $0x70] sm:$0xff]  ;;  %v451_v51 = vld [vmem:[#allocation2 + $0x78] sm:$0xff]  ;;  %v523_v53 = vld [vmem:[#allocation5] sm:$0xff] }
  0x4f   :  { %917 = vmatpush3.bf16.msra.mxu0 %v916_v54  ;;  %v967_v52 = vpack.c.bf16 %v451_v51, %v450_v49  ;;  %v524_v54 = vld [vmem:[#allocation5 + $0x8] sm:$0xff]  ;;  %v526_v57 = vld [vmem:[#allocation5 + $0x18] sm:$0xff]  ;;  %v527_v59 = vld [vmem:[#allocation5 + $0x20] sm:$0xff]  ;;  %p1053_p6 = pnand %p1052_p5, %p1046_p2 }
  0x50   :  { %919 = vmatprep.subr.bf16.mxu0 %v918_v55  ;;  %774 = vmatmul.mubr.msk.f32.vlgmr.msra.gmra.mrb[2].mxu1 %vm151_vm1, %v52_v61  ;;  %v525_v55 = vld [vmem:[#allocation5 + $0x10] sm:$0xff]  ;;  %v970_v56 = vpack.c.bf16 %v524_v54, %v523_v53  ;;  %v531_v1 = vld [vmem:[#allocation5 + $0x40] sm:$0xff]  ;;  %v532_v2 = vld [vmem:[#allocation5 + $0x48] sm:$0xff] }
  0x51   :  { %808 = vmatprep.mubr.msk.f32.mxu1 %vm1078_vm0, %v1079_v60  ;;  %947 = vmatpush3.bf16.msra.mxu1 %v946_v31  ;;  %v973_v58 = vpack.c.bf16 %v526_v57, %v525_v55  ;;  %v982_v3 = vpack.c.bf16 %v532_v2, %v531_v1  ;;  %v535_v7 = vld [vmem:[#allocation5 + $0x60] sm:$0xff]  ;;  %v536_v8 = vld [vmem:[#allocation5 + $0x68] sm:$0xff]  ;;  %v537_v25 = vld [vmem:[#allocation5 + $0x70] sm:$0xff] }
  0x52   :  { %948 = vmatprep.subr.bf16.mxu1 %v1077_v50  ;;  %v988_v9 = vpack.c.bf16 %v536_v8, %v535_v7 }
  0x53   :  { %921 = vmatpush3.bf16.msra.mxu0 %v920_v62  ;;  %v529_v62 = vld [vmem:[#allocation5 + $0x30] sm:$0xff] }
  0x54   :  { %923 = vmatprep.subr.bf16.mxu0 %v922_v63  ;;  %v530_v63 = vld [vmem:[#allocation5 + $0x38] sm:$0xff] }
  0x55   :  { %950 = vmatpush3.bf16.msra.mxu1 %v949_v33  ;;  %v979_v0 = vpack.c.bf16 %v530_v63, %v529_v62 }
  0x56   :  { %951 = vmatprep.subr.bf16.mxu1 %v1077_v50 }
  0x57   :  { %925 = vmatpush3.bf16.msra.mxu0 %v924_v4  ;;  %v533_v4 = vld [vmem:[#allocation5 + $0x50] sm:$0xff] }
  0x58   :  { %927 = vmatprep.subr.bf16.mxu0 %v926_v5  ;;  %v534_v5 = vld [vmem:[#allocation5 + $0x58] sm:$0xff] }
  0x59   :  { %953 = vmatpush3.bf16.msra.mxu1 %v952_v36  ;;  %v985_v6 = vpack.c.bf16 %v534_v5, %v533_v4 }
  0x5a   :  { %954 = vmatprep.subr.bf16.mxu1 %v1077_v50 }
  0x5b   :  { %929 = vmatpush3.bf16.msra.mxu0 %v928_v10 }
  0x5c   :  { %931 = vmatprep.subr.bf16.mxu0 %v930_v11 }
  0x5d   :  { %956 = vmatpush3.bf16.msra.mxu1 %v955_v39 }
  0x5e   :  { %957 = vmatprep.subr.bf16.mxu1 %v1077_v50 }
  0x5f   :  { %933 = vmatpush3.bf16.msra.mxu0 %v932_v16 }
  0x60   :  { %935 = vmatprep.subr.bf16.mxu0 %v934_v17 }
  0x61   :  { %959 = vmatpush3.bf16.msra.mxu1 %v958_v42 }
  0x62   :  { %960 = vmatprep.subr.bf16.mxu1 %v1077_v50 }
  0x63   :  { %937 = vmatpush3.bf16.msra.mxu0 %v936_v22 }
  0x64   :  { %939 = vmatprep.subr.bf16.mxu0 %v938_v23 }
  0x65   :  { %962 = vmatpush3.bf16.msra.mxu1 %v961_v45 }
  0x66   :  { %963 = vmatprep.subr.bf16.mxu1 %v1077_v50 }
  0x67   :  { %941 = vmatpush3.bf16.msra.mxu0 %v940_v26  ;;  %v538_v26 = vld [vmem:[#allocation5 + $0x78] sm:$0xff] }
  0x68   :  { %969 = vmatprep.subr.bf16.mxu0 %v1077_v50 }
  0x69   :  { %965 = vmatpush3.bf16.msra.mxu1 %v964_v48 }
  0x6a   :  { %360 = vmatmul.mubr.f32.vlgmr.msra.gmra.mrb[2].mxu0 %v50_v27  ;;  %966 = vmatprep.subr.bf16.mxu1 %v1077_v50  ;;  %v991_v27 = vpack.c.bf16 %v538_v26, %v537_v25 }
  0x6b   :  { %843 = vmatprep.mubr.msk.f32.mxu0 %vm1078_vm0, %v1079_v60  ;;  %971 = vmatpush3.bf16.msra.mxu0 %v970_v56  ;;  %v528_v60 = vld [vmem:[#allocation5 + $0x28] sm:$0xff] }
  0x6c   :  { %972 = vmatprep.subr.bf16.mxu0 %v1077_v50  ;;  %v976_v61 = vpack.c.bf16 %v528_v60, %v527_v59 }
  0x6d   :  { %968 = vmatpush3.bf16.msra.mxu1 %v967_v52 }
  0x6f   :  { %974 = vmatpush3.bf16.msra.mxu0 %v973_v58 }
  0x70   :  { %975 = vmatprep.subr.bf16.mxu0 %v1077_v50 }
  0x73   :  { %977 = vmatpush3.bf16.msra.mxu0 %v976_v61 }
  0x74   :  { %978 = vmatprep.subr.bf16.mxu0 %v1077_v50 }
  0x77   :  { %980 = vmatpush3.bf16.msra.mxu0 %v979_v0 }
  0x78   :  { %981 = vmatprep.subr.bf16.mxu0 %v1077_v50 }
  0x7b   :  { %983 = vmatpush3.bf16.msra.mxu0 %v982_v3 }
  0x7c   :  { %984 = vmatprep.subr.bf16.mxu0 %v1077_v50 }
  0x7f   :  { %986 = vmatpush3.bf16.msra.mxu0 %v985_v6 }
  0x80   :  { %987 = vmatprep.subr.bf16.mxu0 %v1077_v50 }
  0x83   :  { %989 = vmatpush3.bf16.msra.mxu0 %v988_v9 }
  0x84   :  { %990 = vmatprep.subr.bf16.mxu0 %v1077_v50 }
  0x87   :  { %992 = vmatpush3.bf16.msra.mxu0 %v991_v27 }
 0x11d   :  { %v659_v10 = vpop.f32.mrb[0].mxu0 }
 0x11e   :  { %v694_v11 = vpop.f32.mrb[0].mxu1  ;;  %v660_v12 = vpop.f32.mrb[1].mxu0 }
 0x11f   :  { %v661_v13 = vadd.f32 %v660_v12, %v659_v10  ;;  %v695_v14 = vpop.f32.mrb[1].mxu1 }
 0x120   :  { %v696_v15 = vadd.f32 %v695_v14, %v694_v11 }
 0x122   :  { %v292_v16 = vadd.f32 %v696_v15, %v661_v13 }
 0x123   :  { %v431_v17 = vpop.f32.mrb[2].mxu1 }
 0x124   :  { %v775_v18 = vpop.f32.mrb[3].mxu1 }
 0x13d   :  { %v729_v19 = vpop.f32.mrb[2].mxu0 }
 0x13e   :  { %v730_v20 = vpop.f32.mrb[3].mxu0 }
 0x13f   :  { %v731_v21 = vadd.f32 %v730_v20, %v729_v19 }
 0x141   :  { %v362_v22 = vadd.f32 %v731_v21, %v292_v16 }
 0x143   :  { %v432_v23 = vadd.f32 %v431_v17, %v362_v22 }
 0x145   :  { %v435_v24 = vmax.f32 %v432_v23, 0.0 }
 0x147   :  { %809 = vmatmul.mubr.f32.vlgmr.msra.gmra.mrb[4].mxu1 %v435_v24 }
 0x21a   :  { %v518_v50 = vpop.f32.mrb[4].mxu1 }
 0x21b   :  { %v522_v28 = vmax.f32 %v518_v50, 0.0  ;;  %v810_v29 = vpop.f32.mrb[5].mxu1 }
 0x21d   :  { %844 = vmatmul.mubr.f32.vlgmr.msra.gmra.mrb[4].mxu0 %v522_v28 }
 0x2f0   :  { %v605_v30 = vpop.f32.mrb[4].mxu0 }
 0x2f1   :  { %609 = vst [vmem:[#allocation7] sm:$0xff] %v605_v30  ;;  %v845_v31 = vpop.f32.mrb[5].mxu0 }
 0x2f2   :  { %1056 = shalt.err (!%p1053_p6)
}
 0x2f3   :  { %s1057_s30 = scalar_lea.hbm %s1481_s4, 128 }
 0x2f4   :  { %p1058_p7 = scmp.ne.s32.totalorder %s1481_s4, %s1057_s30  ;;  %p1061_p8 = scmp.lt.u32.totalorder %s1057_s30, %s1481_s4 }
 0x2f6   :  { %p1063_p9 = pnand %p1061_p8, %p1058_p7 }
 0x2f8   :  { %1066 = shalt.err (!%p1063_p9)
}
 0x2f9   :  { %619 = dma.vmem_to_hbm [thread:$0]  %s617_s1, 128, %s1481_s4, [#allocation4]  }
 0x2fa   :  { %1071 = dma.done.wait [#allocation4], 128  }
 0x2fb   :  { %1072 = vsyncadd [#allocation4], 4294967168 }
 0x2fc   :  { %623 = vsyncpa [#allocation3], 1 }
 0x2fd   :  { %624 = vsyncpa [#allocation6], 1 }
 0x2fe   :  { %625 = vsyncpa [#allocation4], 1 }

</bundles_post_ra>
